<compile_context>
chip_gen: v6e
topology: v6e:2x2x1
jax: 0.10.0
libtpu: 0.0.40
codegen_flags: <defaults>
</compile_context>

<pallas_src>
import math

import numpy as np
import jax
import jax.numpy as jnp
from jax import lax
from jax.experimental import pallas as pl
from jax.experimental.pallas import tpu as pltpu

HF_MASK_VALUE = -1000000000.0
NEG_CROSS = -1e30          # bias for cross-batch score entries (exp -> exactly 0)

# --- module-consistent configuration ---------------------------------------
BATCH = 2
SEQ = 8                    # T
HIDDEN = 32                # C  (config.hidden_size)
HEADS = 4                  # config.num_attention_heads
DH = HIDDEN // HEADS       # 8
INTER = 64                 # config.intermediate_size
LN_EPS = 1e-12             # config.layer_norm_eps
BT = BATCH * SEQ           # 16 collapsed batch*seq rows
HBT = HEADS * BT           # 64: all heads stacked (lanes for scores / sublanes for K,V)
LANES = 128
SCALE = 1.0 / math.sqrt(DH)
INV_C = 1.0 / HIDDEN

# --- packed-parameter slab layout (single (P_ROWS, 128) f32 slab) -----------
R_WQ = 0                       # (C, C)    lanes 0:C
R_WK = R_WQ + HIDDEN           # (C, C)
R_WV = R_WK + HIDDEN           # (C, C)
R_WSO = R_WV + HIDDEN          # (C, 128)  lanes >=C zero (lane-dense N)
R_WI = R_WSO + HIDDEN          # (128, I)  rows >=C zero (lane-dense K)
R_WO = R_WI + LANES            # (I, 128)  lanes >=C zero (lane-dense N)
R_HM = R_WO + INTER            # (HBT, C)  static head 0/1 mask
R_BD = R_HM + HBT              # (HBT, HBT) static block-diagonal ones
R_VEC = R_BD + HBT             # 11 vector rows
V_BQ, V_BK, V_BV, V_BSO, V_G1, V_BE1, V_BI, V_BO, V_G2, V_BE2, V_ONES = range(11)
P_ROWS = ((R_VEC + 11 + 7) // 8) * 8   # 464

# static (BT,BT) same-batch pattern (constant, never rebuilt per call)
_SAME_BATCH = np.repeat(np.repeat(np.eye(BATCH, dtype=bool), SEQ, axis=0), SEQ, axis=1)


def _gelu_exact(x):
    # matches torch.nn.functional.gelu (erf-based, not tanh approximation)
    return 0.5 * x * (1.0 + jax.lax.erf(x / math.sqrt(2.0)))


def _ln_pad(y, gamma, beta, ones_c):
    """LayerNorm over the first HIDDEN lanes of a 128-lane value.

    `y` has zeros in lanes >= HIDDEN; gamma/beta are zero-padded, so the
    result also has zeros in lanes >= HIDDEN (lane-dense, no relayout).
    """
    mu = jnp.sum(y, axis=-1, keepdims=True) * INV_C
    yc = (y - mu) * ones_c                       # re-zero the padded lanes
    var = jnp.sum(yc * yc, axis=-1, keepdims=True) * INV_C
    return yc * jax.lax.rsqrt(var + LN_EPS) * gamma + beta


def custom_layer_kernel(xs_ref, p_ref, out_ref):
    f32 = jnp.float32
    x = xs_ref[0:BT, 0:HIDDEN]                    # (16, 32) activations
    xpad = xs_ref[0:BT, :]                        # (16, 128) same rows, lanes >=32 zero
    bias = xs_ref[BT:2 * BT, 0:HBT]               # (16, 64) per-head-tiled score bias

    wq = p_ref[R_WQ:R_WQ + HIDDEN, 0:HIDDEN]
    wk = p_ref[R_WK:R_WK + HIDDEN, 0:HIDDEN]
    wv = p_ref[R_WV:R_WV + HIDDEN, 0:HIDDEN]
    wso = p_ref[R_WSO:R_WSO + HIDDEN, :]          # (32, 128) zero-padded N
    wi = p_ref[R_WI:R_WI + LANES, 0:INTER]        # (128, 64) zero-padded K
    wo = p_ref[R_WO:R_WO + INTER, :]              # (64, 128) zero-padded N
    hm = p_ref[R_HM:R_HM + HBT, 0:HIDDEN]         # (64, 32) head 0/1 mask
    bd = p_ref[R_BD:R_BD + HBT, 0:HBT]            # (64, 64) block-diagonal ones

    def vec(i, w=LANES):
        return p_ref[R_VEC + i:R_VEC + i + 1, 0:w]

    bq, bk, bv = vec(V_BQ, HIDDEN), vec(V_BK, HIDDEN), vec(V_BV, HIDDEN)
    bso, g1, be1 = vec(V_BSO), vec(V_G1), vec(V_BE1)
    bi = vec(V_BI, INTER)
    bo, g2, be2 = vec(V_BO), vec(V_G2), vec(V_BE2)
    ones_c = vec(V_ONES)

    # --- projections (heads stay lane-contiguous; no per-head slicing) ------
    q = jnp.dot(x, wq, preferred_element_type=f32) + bq                 # (16, 32)
    xt = jnp.concatenate([x, x, x, x], axis=0)                          # (64, 32)
    kbig = (jnp.dot(xt, wk, preferred_element_type=f32) + bk) * hm      # (64, 32)
    vbig = (jnp.dot(xt, wv, preferred_element_type=f32) + bv) * hm      # (64, 32)

    # --- attention: all heads & both batch elements in 3 MXU ops ------------
    s = lax.dot_general(q, kbig, (((1,), (1,)), ((), ())),
                        preferred_element_type=f32)                     # (16, 64)
    s = s * SCALE + bias
    # Row-wise max equals the per-head max up to O(1) (mask is shared across
    # heads), so per-head softmax is unchanged; keeps fully-masked rows finite.
    s = s - jnp.max(s, axis=-1, keepdims=True)
    e = jnp.exp(s)
    denom = jnp.dot(e, bd, preferred_element_type=f32)   # per-head sums, broadcast
    p = e / denom                                        # exact division
    ctx = jnp.dot(p, vbig, preferred_element_type=f32)   # (16, 32) heads merged in-place

    # --- self_output: Linear + (dropout=id) + residual + LayerNorm ----------
    # TODO(synk): dropout is identity (eval-mode); training would need PRNG masking.
    so = _ln_pad(jnp.dot(ctx, wso, preferred_element_type=f32) + bso + xpad,
                 g1, be1, ones_c)                                        # (16, 128)

    # --- intermediate: Linear + exact GELU -----------------------------------
    inter = _gelu_exact(jnp.dot(so, wi, preferred_element_type=f32) + bi)  # (16, 64)

    # --- output: Linear + (dropout=id) + residual + LayerNorm ----------------
    out = _ln_pad(jnp.dot(inter, wo, preferred_element_type=f32) + bo + so,
                  g2, be2, ones_c)                                       # (16, 128)
    out_ref[...] = out.astype(out_ref.dtype)


def pack_params(params):
    """One-time (hoisted) packing of all weights/biases/static masks into a
    single 128-lane f32 slab."""
    P = np.zeros((P_ROWS, LANES), np.float32)
    P[R_WQ:R_WQ + HIDDEN, 0:HIDDEN] = np.asarray(params["wq"])
    P[R_WK:R_WK + HIDDEN, 0:HIDDEN] = np.asarray(params["wk"])
    P[R_WV:R_WV + HIDDEN, 0:HIDDEN] = np.asarray(params["wv"])
    P[R_WSO:R_WSO + HIDDEN, 0:HIDDEN] = np.asarray(params["wso"])
    P[R_WI:R_WI + HIDDEN, 0:INTER] = np.asarray(params["wi"])   # K-rows >=C stay zero
    P[R_WO:R_WO + INTER, 0:HIDDEN] = np.asarray(params["wo"])
    # static head mask: row j = h*BT+k belongs to head h = j//BT; lane c to head c//DH
    row_head = np.arange(HBT)[:, None] // BT
    lane_head = np.arange(HIDDEN)[None, :] // DH
    P[R_HM:R_HM + HBT, 0:HIDDEN] = (row_head == lane_head).astype(np.float32)
    # static block-diagonal ones (per-head softmax denominator via one matmul)
    blk = np.arange(HBT) // BT
    P[R_BD:R_BD + HBT, 0:HBT] = (blk[:, None] == blk[None, :]).astype(np.float32)
    # vector rows
    P[R_VEC + V_BQ, 0:HIDDEN] = np.asarray(params["bq"])[0]
    P[R_VEC + V_BK, 0:HIDDEN] = np.asarray(params["bk"])[0]
    P[R_VEC + V_BV, 0:HIDDEN] = np.asarray(params["bv"])[0]
    P[R_VEC + V_BSO, 0:HIDDEN] = np.asarray(params["bso"])[0]
    P[R_VEC + V_G1, 0:HIDDEN] = np.asarray(params["g1"])[0]
    P[R_VEC + V_BE1, 0:HIDDEN] = np.asarray(params["be1"])[0]
    P[R_VEC + V_BI, 0:INTER] = np.asarray(params["bi"])[0]
    P[R_VEC + V_BO, 0:HIDDEN] = np.asarray(params["bo"])[0]
    P[R_VEC + V_G2, 0:HIDDEN] = np.asarray(params["g2"])[0]
    P[R_VEC + V_BE2, 0:HIDDEN] = np.asarray(params["be2"])[0]
    P[R_VEC + V_ONES, 0:HIDDEN] = 1.0
    return jnp.asarray(P)


@jax.jit
def custom_layer(hidden_states, attention_mask, granularity_mask, packed_params):
    """hidden_states: (B, T, C); masks: (B, 1, 1, T) additive float masks."""
    B, T, C = hidden_states.shape
    x = hidden_states.astype(jnp.float32).reshape(B * T, C)

    # combined key mask (torch.clamp(am + gm, min=HF_MASK_VALUE)), block-diagonal
    # batch separation, tiled once per head -> folded into the input slab.
    am = attention_mask.reshape(B, T).astype(jnp.float32)
    gm = granularity_mask.reshape(B, T).astype(jnp.float32)
    key_mask = jnp.maximum(am + gm, HF_MASK_VALUE)                       # (B, T)
    bias16 = jnp.where(_SAME_BATCH,
                       jnp.broadcast_to(key_mask.reshape(1, B * T), (B * T, B * T)),
                       jnp.float32(NEG_CROSS))                           # (16, 16)
    bias_big = jnp.tile(bias16, (1, HEADS))                              # (16, 64)

    xs = jnp.zeros((2 * BT, LANES), jnp.float32)
    xs = xs.at[0:BT, 0:C].set(x)
    xs = xs.at[BT:2 * BT, 0:HBT].set(bias_big)

    out = pl.pallas_call(
        custom_layer_kernel,
        out_shape=jax.ShapeDtypeStruct((BT, LANES), jnp.float32),
        grid_spec=pltpu.PrefetchScalarGridSpec(
            num_scalar_prefetch=0,
            grid=(1,),                         # single invocation, whole slab
            in_specs=[
                pl.BlockSpec((2 * BT, LANES), lambda i: (0, 0)),   # x + score bias
                pl.BlockSpec((P_ROWS, LANES), lambda i: (0, 0)),   # packed params
            ],
            out_specs=pl.BlockSpec((BT, LANES), lambda i: (0, 0)),  # lane-dense output
        ),
        compiler_params=pltpu.CompilerParams(dimension_semantics=("arbitrary",)),
    )(xs, packed_params)
    return out[:, :C].reshape(B, T, C)


# --- pure-JAX reference (for correctness check) ----------------------------
def _layernorm_ref(y, gamma, beta):
    mu = jnp.mean(y, axis=-1, keepdims=True)
    var = jnp.mean((y - mu) ** 2, axis=-1, keepdims=True)
    return (y - mu) * jax.lax.rsqrt(var + LN_EPS) * gamma + beta


def reference(hidden_states, attention_mask, granularity_mask, params):
    B, T, C = hidden_states.shape
    x = hidden_states.astype(jnp.float32)
    q = x @ params["wq"] + params["bq"]
    k = x @ params["wk"] + params["bk"]
    v = x @ params["wv"] + params["bv"]
    q = q.reshape(B, T, HEADS, DH).transpose(0, 2, 1, 3)
    k = k.reshape(B, T, HEADS, DH).transpose(0, 2, 1, 3)
    v = v.reshape(B, T, HEADS, DH).transpose(0, 2, 1, 3)
    mask = jnp.maximum(attention_mask + granularity_mask, HF_MASK_VALUE)  # (B,1,1,T)
    s = jnp.einsum("bhqd,bhkd->bhqk", q, k) * SCALE + mask
    p = jax.nn.softmax(s, axis=-1)
    ctx = jnp.einsum("bhqk,bhkd->bhqd", p, v).transpose(0, 2, 1, 3).reshape(B, T, C)
    so = _layernorm_ref(ctx @ params["wso"] + params["bso"] + x, params["g1"], params["be1"])
    inter = _gelu_exact(so @ params["wi"] + params["bi"])
    out = inter @ params["wo"] + params["bo"]
    return _layernorm_ref(out + so, params["g2"], params["be2"])


def init_params(key):
    ks = jax.random.split(key, 8)
    n = lambda k, shape: (0.02 * jax.random.normal(k, shape)).astype(jnp.float32)
    return {
        "wq": n(ks[0], (HIDDEN, HIDDEN)), "bq": n(ks[1], (1, HIDDEN)),
        "wk": n(ks[2], (HIDDEN, HIDDEN)), "bk": n(ks[3], (1, HIDDEN)),
        "wv": n(ks[4], (HIDDEN, HIDDEN)), "bv": n(ks[5], (1, HIDDEN)),
        "wso": n(ks[6], (HIDDEN, HIDDEN)), "bso": jnp.zeros((1, HIDDEN), jnp.float32),
        "g1": jnp.ones((1, HIDDEN), jnp.float32), "be1": jnp.zeros((1, HIDDEN), jnp.float32),
        "wi": n(ks[7], (HIDDEN, INTER)), "bi": jnp.zeros((1, INTER), jnp.float32),
        "wo": n(jax.random.fold_in(key, 99), (INTER, HIDDEN)),
        "bo": jnp.zeros((1, HIDDEN), jnp.float32),
        "g2": jnp.ones((1, HIDDEN), jnp.float32), "be2": jnp.zeros((1, HIDDEN), jnp.float32),
    }


if __name__ == "__main__":
    key = jax.random.PRNGKey(0)
    kx, km, kg, kp = jax.random.split(key, 4)

    hidden_states = jax.random.normal(kx, (BATCH, SEQ, HIDDEN), jnp.float32)
    # additive masks: mask out a few key positions per batch element
    keep = (jax.random.uniform(km, (BATCH, 1, 1, SEQ)) > 0.2).astype(jnp.float32)
    attention_mask = (1.0 - keep) * HF_MASK_VALUE
    granularity_mask = (jax.random.uniform(kg, (BATCH, 1, 1, SEQ)) > 0.8).astype(
        jnp.float32) * HF_MASK_VALUE

    params = init_params(kp)
    packed = jax.block_until_ready(pack_params(params))   # hoisted, done once

    out = custom_layer(hidden_states, attention_mask, granularity_mask, packed)
    out = jax.block_until_ready(out)

    ref = reference(hidden_states, attention_mask, granularity_mask, params)
    assert out.shape == (BATCH, SEQ, HIDDEN)
    assert jnp.allclose(out, ref, atol=1e-4, rtol=1e-4), float(jnp.max(jnp.abs(out - ref)))
    print("KERNEL_OK")
</pallas_src>

<mosaic_0001>
module attributes {stable_mosaic.version = 11 : i64} {
  func.func @custom_layer_kernel(%arg0: i32, %arg1: memref<32x128xf32, #tpu.memory_space<vmem>>, %arg2: memref<464x128xf32, #tpu.memory_space<vmem>>, %arg3: memref<16x128xf32, #tpu.memory_space<vmem>>) attributes {dimension_semantics = [#tpu.dimension_semantics<arbitrary>], iteration_bounds = array<i64: 1>, scalar_prefetch = 0 : i64, scratch_operands = 0 : i64, tpu.core_type = #tpu.core_type<tc>, window_params = [{pipeline_mode = #tpu.pipeline_mode<synchronous>, transform_indices = @transform_0, window_bounds = array<i64: 32, 128>}, {pipeline_mode = #tpu.pipeline_mode<synchronous>, transform_indices = @transform_1, window_bounds = array<i64: 464, 128>}, {pipeline_mode = #tpu.pipeline_mode<synchronous>, transform_indices = @transform_2, window_bounds = array<i64: 16, 128>}]} {
    %c0 = arith.constant 0 : index
    %c0_0 = arith.constant 0 : index
    %0 = vector.load %arg1[%c0, %c0_0] : memref<32x128xf32, #tpu.memory_space<vmem>>, vector<16x32xf32>
    %c0_1 = arith.constant 0 : index
    %c0_2 = arith.constant 0 : index
    %1 = vector.load %arg1[%c0_1, %c0_2] : memref<32x128xf32, #tpu.memory_space<vmem>>, vector<16x128xf32>
    %c16 = arith.constant 16 : index
    %c0_3 = arith.constant 0 : index
    %2 = vector.load %arg1[%c16, %c0_3] : memref<32x128xf32, #tpu.memory_space<vmem>>, vector<16x64xf32>
    %c0_4 = arith.constant 0 : index
    %c0_5 = arith.constant 0 : index
    %3 = vector.load %arg2[%c0_4, %c0_5] : memref<464x128xf32, #tpu.memory_space<vmem>>, vector<32x32xf32>
    %c32 = arith.constant 32 : index
    %c0_6 = arith.constant 0 : index
    %4 = vector.load %arg2[%c32, %c0_6] : memref<464x128xf32, #tpu.memory_space<vmem>>, vector<32x32xf32>
    %c64 = arith.constant 64 : index
    %c0_7 = arith.constant 0 : index
    %5 = vector.load %arg2[%c64, %c0_7] : memref<464x128xf32, #tpu.memory_space<vmem>>, vector<32x32xf32>
    %c96 = arith.constant 96 : index
    %c0_8 = arith.constant 0 : index
    %6 = vector.load %arg2[%c96, %c0_8] : memref<464x128xf32, #tpu.memory_space<vmem>>, vector<32x128xf32>
    %c128 = arith.constant 128 : index
    %c0_9 = arith.constant 0 : index
    %7 = vector.load %arg2[%c128, %c0_9] : memref<464x128xf32, #tpu.memory_space<vmem>>, vector<128x64xf32>
    %c256 = arith.constant 256 : index
    %c0_10 = arith.constant 0 : index
    %8 = vector.load %arg2[%c256, %c0_10] : memref<464x128xf32, #tpu.memory_space<vmem>>, vector<64x128xf32>
    %c320 = arith.constant 320 : index
    %c0_11 = arith.constant 0 : index
    %9 = vector.load %arg2[%c320, %c0_11] : memref<464x128xf32, #tpu.memory_space<vmem>>, vector<64x32xf32>
    %c384 = arith.constant 384 : index
    %c0_12 = arith.constant 0 : index
    %10 = vector.load %arg2[%c384, %c0_12] : memref<464x128xf32, #tpu.memory_space<vmem>>, vector<64x64xf32>
    %c448 = arith.constant 448 : index
    %c0_13 = arith.constant 0 : index
    %11 = vector.load %arg2[%c448, %c0_13] : memref<464x128xf32, #tpu.memory_space<vmem>>, vector<1x32xf32>
    %c449 = arith.constant 449 : index
    %c0_14 = arith.constant 0 : index
    %12 = vector.load %arg2[%c449, %c0_14] : memref<464x128xf32, #tpu.memory_space<vmem>>, vector<1x32xf32>
    %c450 = arith.constant 450 : index
    %c0_15 = arith.constant 0 : index
    %13 = vector.load %arg2[%c450, %c0_15] : memref<464x128xf32, #tpu.memory_space<vmem>>, vector<1x32xf32>
    %c451 = arith.constant 451 : index
    %c0_16 = arith.constant 0 : index
    %14 = vector.load %arg2[%c451, %c0_16] : memref<464x128xf32, #tpu.memory_space<vmem>>, vector<1x128xf32>
    %c452 = arith.constant 452 : index
    %c0_17 = arith.constant 0 : index
    %15 = vector.load %arg2[%c452, %c0_17] : memref<464x128xf32, #tpu.memory_space<vmem>>, vector<1x128xf32>
    %c453 = arith.constant 453 : index
    %c0_18 = arith.constant 0 : index
    %16 = vector.load %arg2[%c453, %c0_18] : memref<464x128xf32, #tpu.memory_space<vmem>>, vector<1x128xf32>
    %c454 = arith.constant 454 : index
    %c0_19 = arith.constant 0 : index
    %17 = vector.load %arg2[%c454, %c0_19] : memref<464x128xf32, #tpu.memory_space<vmem>>, vector<1x64xf32>
    %c455 = arith.constant 455 : index
    %c0_20 = arith.constant 0 : index
    %18 = vector.load %arg2[%c455, %c0_20] : memref<464x128xf32, #tpu.memory_space<vmem>>, vector<1x128xf32>
    %c456 = arith.constant 456 : index
    %c0_21 = arith.constant 0 : index
    %19 = vector.load %arg2[%c456, %c0_21] : memref<464x128xf32, #tpu.memory_space<vmem>>, vector<1x128xf32>
    %c457 = arith.constant 457 : index
    %c0_22 = arith.constant 0 : index
    %20 = vector.load %arg2[%c457, %c0_22] : memref<464x128xf32, #tpu.memory_space<vmem>>, vector<1x128xf32>
    %c458 = arith.constant 458 : index
    %c0_23 = arith.constant 0 : index
    %21 = vector.load %arg2[%c458, %c0_23] : memref<464x128xf32, #tpu.memory_space<vmem>>, vector<1x128xf32>
    %cst = arith.constant dense<0.000000e+00> : vector<16x32xf32>
    %22 = tpu.matmul %0, %3, %cst {dimension_numbers = #tpu.dot_dimension_numbers<[1], [0], [0], [1], [0, 0, 1, 1], [], []>} : vector<16x32xf32>, vector<32x32xf32>, vector<16x32xf32> -> vector<16x32xf32>
    %23 = vector.broadcast %11 : vector<1x32xf32> to vector<16x32xf32>
    %24 = arith.addf %22, %23 : vector<16x32xf32>
    %25 = tpu.concatenate %0, %0, %0, %0 in 0 : vector<16x32xf32>, vector<16x32xf32>, vector<16x32xf32>, vector<16x32xf32> -> vector<64x32xf32>
    %cst_24 = arith.constant dense<0.000000e+00> : vector<64x32xf32>
    %26 = tpu.matmul %25, %4, %cst_24 {dimension_numbers = #tpu.dot_dimension_numbers<[1], [0], [0], [1], [0, 0, 1, 1], [], []>} : vector<64x32xf32>, vector<32x32xf32>, vector<64x32xf32> -> vector<64x32xf32>
    %27 = vector.broadcast %12 : vector<1x32xf32> to vector<64x32xf32>
    %28 = arith.addf %26, %27 : vector<64x32xf32>
    %29 = arith.mulf %28, %9 : vector<64x32xf32>
    %cst_25 = arith.constant dense<0.000000e+00> : vector<64x32xf32>
    %30 = tpu.matmul %25, %5, %cst_25 {dimension_numbers = #tpu.dot_dimension_numbers<[1], [0], [0], [1], [0, 0, 1, 1], [], []>} : vector<64x32xf32>, vector<32x32xf32>, vector<64x32xf32> -> vector<64x32xf32>
    %31 = vector.broadcast %13 : vector<1x32xf32> to vector<64x32xf32>
    %32 = arith.addf %30, %31 : vector<64x32xf32>
    %33 = arith.mulf %32, %9 : vector<64x32xf32>
    %cst_26 = arith.constant dense<0.000000e+00> : vector<16x64xf32>
    %34 = tpu.matmul %24, %29, %cst_26 {dimension_numbers = #tpu.dot_dimension_numbers<[1], [1], [0], [0], [0, 0, 1, 0], [], []>} : vector<16x32xf32>, vector<64x32xf32>, vector<16x64xf32> -> vector<16x64xf32>
    %cst_27 = arith.constant 0.353553385 : f32
    %35 = vector.broadcast %cst_27 : f32 to vector<16x64xf32>
    %36 = arith.mulf %34, %35 : vector<16x64xf32>
    %37 = arith.addf %36, %2 : vector<16x64xf32>
    %cst_28 = arith.constant dense<0xFF800000> : vector<16xf32>
    %38 = vector.multi_reduction <maximumf>, %37, %cst_28 [1] : vector<16x64xf32> to vector<16xf32>
    %39 = vector.shape_cast %38 : vector<16xf32> to vector<16x1xf32>
    %40 = vector.broadcast %39 : vector<16x1xf32> to vector<16x64xf32>
    %41 = arith.subf %37, %40 : vector<16x64xf32>
    %42 = math.exp %41 : vector<16x64xf32>
    %cst_29 = arith.constant dense<0.000000e+00> : vector<16x64xf32>
    %43 = tpu.matmul %42, %10, %cst_29 {dimension_numbers = #tpu.dot_dimension_numbers<[1], [0], [0], [1], [0, 0, 1, 1], [], []>} : vector<16x64xf32>, vector<64x64xf32>, vector<16x64xf32> -> vector<16x64xf32>
    %44 = arith.divf %42, %43 : vector<16x64xf32>
    %cst_30 = arith.constant dense<0.000000e+00> : vector<16x32xf32>
    %45 = tpu.matmul %44, %33, %cst_30 {dimension_numbers = #tpu.dot_dimension_numbers<[1], [0], [0], [1], [0, 0, 1, 1], [], []>} : vector<16x64xf32>, vector<64x32xf32>, vector<16x32xf32> -> vector<16x32xf32>
    %cst_31 = arith.constant dense<0.000000e+00> : vector<16x128xf32>
    %46 = tpu.matmul %45, %6, %cst_31 {dimension_numbers = #tpu.dot_dimension_numbers<[1], [0], [0], [1], [0, 0, 1, 1], [], []>} : vector<16x32xf32>, vector<32x128xf32>, vector<16x128xf32> -> vector<16x128xf32>
    %47 = vector.broadcast %14 : vector<1x128xf32> to vector<16x128xf32>
    %48 = arith.addf %46, %47 : vector<16x128xf32>
    %49 = arith.addf %48, %1 : vector<16x128xf32>
    %cst_32 = arith.constant dense<0.000000e+00> : vector<16xf32>
    %50 = vector.multi_reduction <add>, %49, %cst_32 [1] : vector<16x128xf32> to vector<16xf32>
    %51 = vector.shape_cast %50 : vector<16xf32> to vector<16x1xf32>
    %cst_33 = arith.constant 3.125000e-02 : f32
    %52 = vector.broadcast %cst_33 : f32 to vector<16x1xf32>
    %53 = arith.mulf %51, %52 : vector<16x1xf32>
    %54 = vector.broadcast %53 : vector<16x1xf32> to vector<16x128xf32>
    %55 = arith.subf %49, %54 : vector<16x128xf32>
    %56 = vector.broadcast %21 : vector<1x128xf32> to vector<16x128xf32>
    %57 = arith.mulf %55, %56 : vector<16x128xf32>
    %58 = arith.mulf %57, %57 : vector<16x128xf32>
    %cst_34 = arith.constant dense<0.000000e+00> : vector<16xf32>
    %59 = vector.multi_reduction <add>, %58, %cst_34 [1] : vector<16x128xf32> to vector<16xf32>
    %60 = vector.shape_cast %59 : vector<16xf32> to vector<16x1xf32>
    %cst_35 = arith.constant 3.125000e-02 : f32
    %61 = vector.broadcast %cst_35 : f32 to vector<16x1xf32>
    %62 = arith.mulf %60, %61 : vector<16x1xf32>
    %cst_36 = arith.constant 9.99999996E-13 : f32
    %63 = vector.broadcast %cst_36 : f32 to vector<16x1xf32>
    %64 = arith.addf %62, %63 : vector<16x1xf32>
    %65 = math.rsqrt %64 : vector<16x1xf32>
    %66 = vector.broadcast %65 : vector<16x1xf32> to vector<16x128xf32>
    %67 = arith.mulf %57, %66 : vector<16x128xf32>
    %68 = vector.broadcast %15 : vector<1x128xf32> to vector<16x128xf32>
    %69 = arith.mulf %67, %68 : vector<16x128xf32>
    %70 = vector.broadcast %16 : vector<1x128xf32> to vector<16x128xf32>
    %71 = arith.addf %69, %70 : vector<16x128xf32>
    %cst_37 = arith.constant dense<0.000000e+00> : vector<16x64xf32>
    %72 = tpu.matmul %71, %7, %cst_37 {dimension_numbers = #tpu.dot_dimension_numbers<[1], [0], [0], [1], [0, 0, 1, 1], [], []>} : vector<16x128xf32>, vector<128x64xf32>, vector<16x64xf32> -> vector<16x64xf32>
    %73 = vector.broadcast %17 : vector<1x64xf32> to vector<16x64xf32>
    %74 = arith.addf %72, %73 : vector<16x64xf32>
    %cst_38 = arith.constant 5.000000e-01 : f32
    %75 = vector.broadcast %cst_38 : f32 to vector<16x64xf32>
    %76 = arith.mulf %75, %74 : vector<16x64xf32>
    %cst_39 = arith.constant 1.41421354 : f32
    %77 = vector.broadcast %cst_39 : f32 to vector<16x64xf32>
    %78 = arith.divf %74, %77 : vector<16x64xf32>
    %79 = math.erf %78 : vector<16x64xf32>
    %cst_40 = arith.constant 1.000000e+00 : f32
    %80 = vector.broadcast %cst_40 : f32 to vector<16x64xf32>
    %81 = arith.addf %80, %79 : vector<16x64xf32>
    %82 = arith.mulf %76, %81 : vector<16x64xf32>
    %cst_41 = arith.constant dense<0.000000e+00> : vector<16x128xf32>
    %83 = tpu.matmul %82, %8, %cst_41 {dimension_numbers = #tpu.dot_dimension_numbers<[1], [0], [0], [1], [0, 0, 1, 1], [], []>} : vector<16x64xf32>, vector<64x128xf32>, vector<16x128xf32> -> vector<16x128xf32>
    %84 = vector.broadcast %18 : vector<1x128xf32> to vector<16x128xf32>
    %85 = arith.addf %83, %84 : vector<16x128xf32>
    %86 = arith.addf %85, %71 : vector<16x128xf32>
    %cst_42 = arith.constant dense<0.000000e+00> : vector<16xf32>
    %87 = vector.multi_reduction <add>, %86, %cst_42 [1] : vector<16x128xf32> to vector<16xf32>
    %88 = vector.shape_cast %87 : vector<16xf32> to vector<16x1xf32>
    %cst_43 = arith.constant 3.125000e-02 : f32
    %89 = vector.broadcast %cst_43 : f32 to vector<16x1xf32>
    %90 = arith.mulf %88, %89 : vector<16x1xf32>
    %91 = vector.broadcast %90 : vector<16x1xf32> to vector<16x128xf32>
    %92 = arith.subf %86, %91 : vector<16x128xf32>
    %93 = vector.broadcast %21 : vector<1x128xf32> to vector<16x128xf32>
    %94 = arith.mulf %92, %93 : vector<16x128xf32>
    %95 = arith.mulf %94, %94 : vector<16x128xf32>
    %cst_44 = arith.constant dense<0.000000e+00> : vector<16xf32>
    %96 = vector.multi_reduction <add>, %95, %cst_44 [1] : vector<16x128xf32> to vector<16xf32>
    %97 = vector.shape_cast %96 : vector<16xf32> to vector<16x1xf32>
    %cst_45 = arith.constant 3.125000e-02 : f32
    %98 = vector.broadcast %cst_45 : f32 to vector<16x1xf32>
    %99 = arith.mulf %97, %98 : vector<16x1xf32>
    %cst_46 = arith.constant 9.99999996E-13 : f32
    %100 = vector.broadcast %cst_46 : f32 to vector<16x1xf32>
    %101 = arith.addf %99, %100 : vector<16x1xf32>
    %102 = math.rsqrt %101 : vector<16x1xf32>
    %103 = vector.broadcast %102 : vector<16x1xf32> to vector<16x128xf32>
    %104 = arith.mulf %94, %103 : vector<16x128xf32>
    %105 = vector.broadcast %19 : vector<1x128xf32> to vector<16x128xf32>
    %106 = arith.mulf %104, %105 : vector<16x128xf32>
    %107 = vector.broadcast %20 : vector<1x128xf32> to vector<16x128xf32>
    %108 = arith.addf %106, %107 : vector<16x128xf32>
    %c0_47 = arith.constant 0 : index
    %c0_48 = arith.constant 0 : index
    %109 = vector.load %arg3[%c0_47, %c0_48] : memref<16x128xf32, #tpu.memory_space<vmem>>, vector<16x128xf32>
    tpu.vector_store %arg3[%c0_47, %c0_48], %108 {strides = array<i32>} : memref<16x128xf32, #tpu.memory_space<vmem>>, vector<16x128xf32>,
    return
  }
  func.func @transform_0(%arg0: i32) -> (i32, i32) {
    %c0_i32 = arith.constant 0 : i32
    %c0_i32_0 = arith.constant 0 : i32
    %c0_i32_1 = arith.constant 0 : i32
    return %c0_i32, %c0_i32_0 : i32, i32
  }
  func.func @transform_1(%arg0: i32) -> (i32, i32) {
    %c0_i32 = arith.constant 0 : i32
    %c0_i32_0 = arith.constant 0 : i32
    %c0_i32_1 = arith.constant 0 : i32
    return %c0_i32, %c0_i32_0 : i32, i32
  }
  func.func @transform_2(%arg0: i32) -> (i32, i32) {
    %c0_i32 = arith.constant 0 : i32
    %c0_i32_0 = arith.constant 0 : i32
    %c0_i32_1 = arith.constant 0 : i32
    return %c0_i32, %c0_i32_0 : i32, i32
  }
}

</mosaic_0001>

<bundles_post_ra>
// kernel: custom_layer.1
= control target key start
LH: loop header
LB: loop body
LE: loop exit
PB: predicated region body
PF: predicated region fallthrough
CT: control target
= control target key end

     0   :  { %7 = vsyncpa [#allocation3], 0  ;;  %s1410_s9 = smov [#allocation2]   ;;  %s1557_s0 = inlined_call_operand.vmem [shape: f32[32,128], index: 0, kind: input, shape index: {}]   ;;  %s1558_s1 = inlined_call_operand.hbm [shape: f32[464,128], index: 1, kind: input, shape index: {}]   ;;  %s1559_s2 = inlined_call_operand.vmem [shape: f32[16,128], index: 2, kind: output, shape index: {}]  }
   0x1   :  { %s15_s10 = sshll.u32 %s1410_s9, 4  ;;  %s16_s10 = int_to_ptr.vmem [resolvable:$true] %s15_s10 }
   0x2   :  { %s1396_s11 = scalar_lea.vmem %s16_s10, 7424  ;;  %p1401_p1 = scmp.lt.s32.totalorder %s16_s10, %s16_s10 }
   0x3   :  { %p1397_p0 = scmp.ne.s32.totalorder %s16_s10, %s1396_s11  ;;  %p1402_p2 = scmp.lt.s32.totalorder %s1396_s11, %s1396_s11 }
   0x5   :  { %p1403_p3 = por %p1402_p2, %p1401_p1 }
   0x7   :  { %p1404_p4 = pnand %p1403_p3, %p1397_p0 }
   0x9   :  { %1407 = shalt.err (!%p1404_p4)
}
   0xa   :  { %s1411_s12 = smov 128   ;;  %s1412_s13 = smov 8  }
   0xb   :  { %21 = dma.hbm_to_vmem [thread:$0]  %s1558_s1, 7424, %s16_s10, [#allocation3], %s1411_s12, %s1411_s12, %s1412_s13  }
   0xc   :  { %1408 = dma.done.wait [#allocation3], 7424  }
   0xd   :  { %1409 = vsyncadd [#allocation3], 4294959872  ;;  %vm100_vm0 = vcmask 261120   ;;  %v32_v0 = vld [vmem:[#allocation2 + $0x18] sm:$0xff]  ;;  %v31_v1 = vld [vmem:[#allocation2 + $0x10] sm:$0xff]  ;;  %vm525_vm1 = vcmask 523264  }
   0xe   :  { %1192 = vmatprep.subr.mxu1 %v32_v0  ;;  %v1434_v2 = vld [vmem:[%s1557_s0] sm:$0xff]  ;;  %v30_v3 = vld [vmem:[#allocation2 + $0x8] sm:$0xff]  ;;  %v36_v6 = vld [vmem:[#allocation2 + $0x38] sm:$0xff] }
   0xf   :  { %1193 = vmatpush3.msra.mxu1 %v32_v0  ;;  %1200 = vmatprep.mubr.msk.f32.mxu1 %vm100_vm0, %v1434_v2  ;;  %v29_v4 = vld [vmem:[#allocation2] sm:$0xff]  ;;  %v1443_v5 = vld [vmem:[%s1557_s0 + $0x8] sm:$0xff]  ;;  %v35_v7 = vld [vmem:[#allocation2 + $0x30] sm:$0xff] }
  0x10   :  { %1194 = vmatprep.subr.mxu1 %v31_v1  ;;  %1231 = vmatprep.mubr.msk.f32.mxu0 %vm100_vm0, %v1434_v2  ;;  %v34_v8 = vld [vmem:[#allocation2 + $0x28] sm:$0xff]  ;;  %v33_v9 = vld [vmem:[#allocation2 + $0x20] sm:$0xff]  ;;  %v1464_v21 = vld [vmem:[#allocation2 + $0x178] sm:$0xff] }
  0x11   :  { %1195 = vmatpush3.msra.mxu1 %v31_v1  ;;  %v1051_v11 = vld [vmem:[#allocation2 + $0x1c0] ss:$0 sm:$0xff]  ;;  %v1054_v20 = vld [vmem:[#allocation2 + $0x1c1] ss:$0 sm:$0xff]  ;;  %v1466_v24 = vld [vmem:[#allocation2 + $0x170] sm:$0xff] }
  0x12   :  { %1196 = vmatprep.subr.mxu1 %v30_v3  ;;  %v1471_v30 = vld [vmem:[#allocation2 + $0x168] sm:$0xff]  ;;  %v1476_v33 = vld [vmem:[#allocation2 + $0x160] sm:$0xff]  ;;  %v1481_v36 = vld [vmem:[#allocation2 + $0x158] sm:$0xff] }
  0x13   :  { %1197 = vmatpush3.msra.mxu1 %v30_v3  ;;  %v1486_v39 = vld [vmem:[#allocation2 + $0x150] sm:$0xff]  ;;  %v1491_v42 = vld [vmem:[#allocation2 + $0x148] sm:$0xff]  ;;  %v1496_v45 = vld [vmem:[#allocation2 + $0x140] sm:$0xff] }
  0x14   :  { %1198 = vmatprep.subr.mxu1 %v29_v4  ;;  %v40_v48 = vld [vmem:[#allocation2 + $0x58] sm:$0xff]  ;;  %v39_v49 = vld [vmem:[#allocation2 + $0x50] sm:$0xff]  ;;  %v38_v50 = vld [vmem:[#allocation2 + $0x48] sm:$0xff] }
  0x15   :  { %1199 = vmatpush3.msra.mxu1 %v29_v4  ;;  %1223 = vmatprep.subr.mxu0 %v40_v48  ;;  %v37_v51 = vld [vmem:[#allocation2 + $0x40] sm:$0xff]  ;;  %v27_v54 = vld [vmem:[%s1557_s0 + $0x10] sm:$0xff]  ;;  %v28_v57 = vld [vmem:[%s1557_s0 + $0x18] sm:$0xff] }
  0x16   :  { %1201 = vmatmul.mubr.msk.f32.vlgmr.msra.gmra.mxu1 %vm100_vm0, %v1443_v5  ;;  %1203 = vmatprep.subr.mxu1 %v36_v6  ;;  %v84_v62 = vld [vmem:[#allocation2 + $0x1b8] sm:$0xff]  ;;  %v83_v63 = vld [vmem:[#allocation2 + $0x1b0] sm:$0xff]  ;;  %v82_v0 = vld [vmem:[#allocation2 + $0x1a8] sm:$0xff] }
  0x17   :  { %1204 = vmatpush3.msra.mxu1 %v36_v6  ;;  %1211 = vmatprep.mubr.msk.f32.mxu1 %vm100_vm0, %v1434_v2  ;;  %v81_v1 = vld [vmem:[#allocation2 + $0x1a0] sm:$0xff]  ;;  %v80_v3 = vld [vmem:[#allocation2 + $0x198] sm:$0xff]  ;;  %v79_v4 = vld [vmem:[#allocation2 + $0x190] sm:$0xff] }
  0x18   :  { %1205 = vmatprep.subr.mxu1 %v35_v7  ;;  %1224 = vmatpush3.msra.mxu0 %v40_v48  ;;  %v78_v6 = vld [vmem:[#allocation2 + $0x188] sm:$0xff] }
  0x19   :  { %1206 = vmatpush3.msra.mxu1 %v35_v7  ;;  %1225 = vmatprep.subr.mxu0 %v39_v49  ;;  %v77_v7 = vld [vmem:[#allocation2 + $0x180] sm:$0xff] }
  0x1a   :  { %1207 = vmatprep.subr.mxu1 %v34_v8  ;;  %1226 = vmatpush3.msra.mxu0 %v39_v49  ;;  %v42_v49 = vld [vmem:[#allocation2 + $0x68] sm:$0xff] }
  0x1b   :  { %1208 = vmatpush3.msra.mxu1 %v34_v8  ;;  %1227 = vmatprep.subr.mxu0 %v38_v50 }
  0x1c   :  { %1209 = vmatprep.subr.mxu1 %v33_v9  ;;  %1228 = vmatpush3.msra.mxu0 %v38_v50  ;;  %v41_v50 = vld [vmem:[#allocation2 + $0x60] sm:$0xff] }
  0x1d   :  { %1210 = vmatpush3.msra.mxu1 %v33_v9  ;;  %1229 = vmatprep.subr.mxu0 %v37_v51  ;;  %v1063_v9 = vld [vmem:[#allocation2 + $0x1c2] ss:$0 sm:$0xff] }
  0x1e   :  { %1212 = vmatmul.mubr.msk.f32.vlgmr.msra.gmra.mxu1 %vm100_vm0, %v1443_v5  ;;  %1230 = vmatpush3.msra.mxu0 %v37_v51 }
  0x1f   :  { %1214 = vmatprep.mubr.msk.f32.mxu1 %vm100_vm0, %v1434_v2  ;;  %1232 = vmatmul.mubr.msk.f32.vlgmr.msra.gmra.mxu0 %vm100_vm0, %v1443_v5 }
  0x20   :  { %1234 = vmatprep.mubr.msk.f32.mxu0 %vm100_vm0, %v1434_v2  ;;  %1262 = vmatprep.subr.mxu0 %v84_v62 }
  0x21   :  { %1263 = vmatpush3.msra.mxu0 %v84_v62 }
  0x22   :  { %1215 = vmatmul.mubr.msk.f32.gmra.mxu1 %vm100_vm0, %v1443_v5  ;;  %1264 = vmatprep.subr.mxu0 %v83_v63 }
  0x23   :  { %1217 = vmatprep.mubr.msk.f32.mxu1 %vm100_vm0, %v1434_v2  ;;  %1235 = vmatmul.mubr.msk.f32.gmra.mxu0 %vm100_vm0, %v1443_v5 }
  0x24   :  { %1237 = vmatprep.mubr.msk.f32.mxu0 %vm100_vm0, %v1434_v2  ;;  %1265 = vmatpush3.msra.mxu0 %v83_v63 }
  0x25   :  { %1266 = vmatprep.subr.mxu0 %v82_v0 }
  0x26   :  { %1218 = vmatmul.mubr.msk.f32.gmra.mxu1 %vm100_vm0, %v1443_v5  ;;  %1267 = vmatpush3.msra.mxu0 %v82_v0  ;;  %v1543_v0 = vld [vmem:[#allocation2 + $0x1ca] ss:$0 sm:$0xff] }
  0x27   :  { %1220 = vmatprep.mubr.msk.f32.mxu1 %vm100_vm0, %v1434_v2  ;;  %1238 = vmatmul.mubr.msk.f32.gmra.mxu0 %vm100_vm0, %v1443_v5 }
  0x28   :  { %1240 = vmatprep.mubr.msk.f32.mxu0 %vm100_vm0, %v1434_v2  ;;  %1268 = vmatprep.subr.mxu0 %v81_v1 }
  0x29   :  { %1269 = vmatpush3.msra.mxu0 %v81_v1 }
  0x2a   :  { %1221 = vmatmul.mubr.msk.f32.gmra.mxu1 %vm100_vm0, %v1443_v5  ;;  %1270 = vmatprep.subr.mxu0 %v80_v3 }
  0x2b   :  { %1241 = vmatmul.mubr.msk.f32.gmra.mxu0 %vm100_vm0, %v1443_v5 }
  0x2c   :  { %1271 = vmatpush3.msra.mxu0 %v80_v3 }
  0x2d   :  { %1272 = vmatprep.subr.mxu0 %v79_v4 }
  0x2e   :  { %1273 = vmatpush3.msra.mxu0 %v79_v4 }
  0x2f   :  { %1274 = vmatprep.subr.mxu0 %v78_v6 }
  0x30   :  { %1275 = vmatpush3.msra.mxu0 %v78_v6 }
  0x31   :  { %1276 = vmatprep.subr.mxu0 %v77_v7 }
  0x32   :  { %1277 = vmatpush3.msra.mxu0 %v77_v7 }
  0xd6   :  { %v1202_v10 = vpop.f32.mrf.mxu1 }
  0xd7   :  { %v179_v47 = vadd.f32 %v1202_v10, %v1051_v11 }
  0xd8   :  { %v173_v12 = vpop.f32.mrf.mxu1 }
  0xd9   :  { %v174_v13 = vadd.f32 %v1051_v11, %v173_v12 }
  0xdb   :  { %1259 = vmatprep.mubr.msk.f32.mxu1 %vm100_vm0, %v174_v13 }
  0xde   :  { %v1213_v14 = vpop.f32.mrf.mxu1 }
  0xdf   :  { %v258_v40 = vadd.f32 %v1213_v14, %v1054_v20  ;;  %v1233_v8 = vpop.f32.mrf.mxu0 }
  0xe0   :  { %v252_v15 = vpop.f32.mrf.mxu1  ;;  %v375_v10 = vadd.f32 %v1233_v8, %v1063_v9 }
  0xe1   :  { %v292_v43 = vmul.f32 %v258_v40, %v1491_v42  ;;  %v253_v44 = vadd.f32 %v1054_v20, %v252_v15  ;;  %v369_v11 = vpop.f32.mrf.mxu0 }
  0xe2   :  { %v1216_v16 = vpop.f32.mrf.mxu1  ;;  %v370_v12 = vadd.f32 %v1063_v9, %v369_v11  ;;  %v56_v11 = vld [vmem:[#allocation2 + $0xd8] sm:$0xff] }
  0xe3   :  { %v268_v34 = vadd.f32 %v1216_v16, %v1054_v20  ;;  %v291_v46 = vmul.f32 %v253_v44, %v1496_v45  ;;  %v1236_v13 = vpop.f32.mrf.mxu0 }
  0xe4   :  { %v262_v17 = vpop.f32.mrf.mxu1  ;;  %v385_v14 = vadd.f32 %v1236_v13, %v1063_v9  ;;  %v54_v13 = vld [vmem:[#allocation2 + $0xc8] sm:$0xff] }
  0xe5   :  { %v294_v37 = vmul.f32 %v268_v34, %v1481_v36  ;;  %v263_v38 = vadd.f32 %v1054_v20, %v262_v17  ;;  %v379_v15 = vpop.f32.mrf.mxu0 }
  0xe6   :  { %v1219_v18 = vpop.f32.mrf.mxu1  ;;  %v380_v16 = vadd.f32 %v1063_v9, %v379_v15  ;;  %v52_v15 = vld [vmem:[#allocation2 + $0xb8] sm:$0xff] }
  0xe7   :  { %v278_v28 = vadd.f32 %v1219_v18, %v1054_v20  ;;  %v293_v41 = vmul.f32 %v263_v38, %v1486_v39  ;;  %v1239_v17 = vpop.f32.mrf.mxu0 }
  0xe8   :  { %v272_v19 = vpop.f32.mrf.mxu1  ;;  %v395_v18 = vadd.f32 %v1239_v17, %v1063_v9  ;;  %v410_v44 = vmul.f32 %v380_v16, %v1486_v39  ;;  %v51_v16 = vld [vmem:[#allocation2 + $0xb0] sm:$0xff]  ;;  %v50_v17 = vld [vmem:[#allocation2 + $0xa8] sm:$0xff] }
  0xe9   :  { %v296_v31 = vmul.f32 %v278_v28, %v1471_v30  ;;  %v273_v32 = vadd.f32 %v1054_v20, %v272_v19  ;;  %v389_v19 = vpop.f32.mrf.mxu0 }
  0xea   :  { %v1222_v22 = vpop.f32.mrf.mxu1 }
  0xeb   :  { %v288_v23 = vadd.f32 %v1222_v22, %v1054_v20  ;;  %v295_v35 = vmul.f32 %v273_v32, %v1476_v33  ;;  %v1242_v22 = vpop.f32.mrf.mxu0 }
  0xec   :  { %v282_v25 = vpop.f32.mrf.mxu1 }
  0xed   :  { %v298_v26 = vmul.f32 %v288_v23, %v1464_v21  ;;  %v283_v27 = vadd.f32 %v1054_v20, %v282_v25  ;;  %v390_v20 = vadd.f32 %v1063_v9, %v389_v19  ;;  %v405_v23 = vadd.f32 %v1242_v22, %v1063_v9  ;;  %v399_v34 = vpop.f32.mrf.mxu0  ;;  %v48_v19 = vld [vmem:[#allocation2 + $0x98] sm:$0xff]  ;;  %v46_v22 = vld [vmem:[#allocation2 + $0x88] sm:$0xff] }
  0xef   :  { %v297_v29 = vmul.f32 %v283_v27, %v1466_v24  ;;  %1243 = vmatprep.subr.msk.mxu1 %vm100_vm0, %v298_v26  ;;  %v415_v25 = vmul.f32 %v405_v23, %v1464_v21  ;;  %v413_v21 = vmul.f32 %v395_v18, %v1471_v30  ;;  %v44_v30 = vld [vmem:[#allocation2 + $0x78] sm:$0xff]  ;;  %v49_v18 = vld [vmem:[#allocation2 + $0xa0] sm:$0xff] }
  0xf0   :  { %1244 = vmatpush3.xpose.msk.msra.mxu1 %vm100_vm0, %v298_v26  ;;  %v45_v23 = vld [vmem:[#allocation2 + $0x80] sm:$0xff] }
  0xf1   :  { %1245 = vmatprep.subr.msk.mxu1 %vm100_vm0, %v297_v29  ;;  %1281 = vmatprep.subr.mxu0 %v415_v25 }
  0xf4   :  { %1246 = vmatpush3.xpose.msk.msra.mxu1 %vm100_vm0, %v297_v29 }
  0xf5   :  { %1247 = vmatprep.subr.msk.mxu1 %vm100_vm0, %v296_v31 }
  0xf8   :  { %1248 = vmatpush3.xpose.msk.msra.mxu1 %vm100_vm0, %v296_v31 }
  0xf9   :  { %1249 = vmatprep.subr.msk.mxu1 %vm100_vm0, %v295_v35 }
  0xfc   :  { %1250 = vmatpush3.xpose.msk.msra.mxu1 %vm100_vm0, %v295_v35  ;;  %v400_v35 = vadd.f32 %v1063_v9, %v399_v34  ;;  %v58_v9 = vld [vmem:[#allocation2 + $0xe8] sm:$0xff]  ;;  %v1090_v34 = vld [vmem:[#allocation2 + $0x1c4] ss:$0 sm:$0xff] }
  0xfd   :  { %1251 = vmatprep.subr.msk.mxu1 %vm100_vm0, %v294_v37 }
  0xfe   :  { %v414_v38 = vmul.f32 %v400_v35, %v1466_v24  ;;  %v409_v24 = vmul.f32 %v375_v10, %v1491_v42  ;;  %v57_v10 = vld [vmem:[#allocation2 + $0xe0] sm:$0xff] }
 0x100   :  { %1252 = vmatpush3.xpose.msk.msra.mxu1 %vm100_vm0, %v294_v37 }
 0x101   :  { %1253 = vmatprep.subr.msk.mxu1 %vm100_vm0, %v293_v41 }
 0x104   :  { %1254 = vmatpush3.xpose.msk.msra.mxu1 %vm100_vm0, %v293_v41  ;;  %v412_v41 = vmul.f32 %v390_v20, %v1476_v33  ;;  %v43_v33 = vld [vmem:[#allocation2 + $0x70] sm:$0xff] }
 0x105   :  { %1255 = vmatprep.subr.msk.mxu1 %vm100_vm0, %v292_v43  ;;  %v47_v20 = vld [vmem:[#allocation2 + $0x90] sm:$0xff] }
 0x108   :  { %1256 = vmatpush3.xpose.msk.msra.mxu1 %vm100_vm0, %v292_v43  ;;  %v411_v43 = vmul.f32 %v385_v14, %v1481_v36  ;;  %v53_v14 = vld [vmem:[#allocation2 + $0xc0] sm:$0xff] }
 0x109   :  { %1257 = vmatprep.subr.msk.mxu1 %vm100_vm0, %v291_v46 }
 0x10c   :  { %1258 = vmatpush3.xpose.msk.msra.mxu1 %vm100_vm0, %v291_v46  ;;  %v408_v46 = vmul.f32 %v370_v12, %v1496_v45  ;;  %v55_v12 = vld [vmem:[#allocation2 + $0xd0] sm:$0xff] }
 0x10d   :  { %1300 = vmatprep.subr.mxu1 %v44_v30 }
 0x10f   :  { %1260 = vmatmul.mubr.msk.f32.vlgmr.msra.gmra.mxu1 %vm100_vm0, %v179_v47 }
 0x110   :  { %1301 = vmatpush3.msra.mxu1 %v44_v30  ;;  %v66_v30 = vld [vmem:[#allocation2 + $0x128] sm:$0xff] }
 0x111   :  { %1302 = vmatprep.subr.mxu1 %v43_v33 }
 0x112   :  { %1303 = vmatpush3.msra.mxu1 %v43_v33  ;;  %v65_v33 = vld [vmem:[#allocation2 + $0x120] sm:$0xff] }
 0x113   :  { %1304 = vmatprep.subr.mxu1 %v42_v49 }
 0x114   :  { %1305 = vmatpush3.msra.mxu1 %v42_v49 }
 0x115   :  { %1306 = vmatprep.subr.mxu1 %v41_v50 }
 0x116   :  { %1307 = vmatpush3.msra.mxu1 %v41_v50 }
 0x1cf   :  { %v1261_v52 = vpop.f32.mrf.mxu1 }
 0x1d0   :  { %v522_v55 = vmul.f32 0.35355338, %v1261_v52 }
 0x1d1   :  { %v512_v53 = vpop.f32.mrf.mxu1 }
 0x1d2   :  { %v521_v56 = vmul.f32 0.35355338, %v512_v53  ;;  %v524_v60 = vadd.f32 %v522_v55, %v28_v57 }
 0x1d4   :  { %v523_v58 = vadd.f32 %v521_v56, %v27_v54  ;;  %v529_v61 = vsel %vm525_vm1, %v524_v60, -inf  ;;  %v1086_v54 = vld [vmem:[#allocation2 + $0x1c3] ss:$0 sm:$0xff] }
 0x1d6   :  { %v526_v59 = vsel %vm525_vm1, %v523_v58, -inf }
 0x1d7   :  { %527 = vmax.xlane.f32.xlu0 %v526_v59 }
 0x1db   :  { %530 = vmax.xlane.f32.xlu0 %v529_v61  ;;  %v59_v61 = vld [vmem:[#allocation2 + $0xf0] sm:$0xff] }
 0x260   :  { %v528_v26 = vpop.xlane.xlu0 %527 }
 0x261   :  { %v532_v27 = vsub.f32 %v523_v58, %v528_v26 }
 0x263   :  { %v534_v28 = vmul.f32 1.442695, %v532_v27 }
 0x264   :  { %v531_v29 = vpop.xlane.xlu0 %530 }
 0x265   :  { %1368 = vpow2.f32 %v534_v28  ;;  %v533_v31 = vsub.f32 %v524_v60, %v531_v29  ;;  %v60_v60 = vld [vmem:[#allocation2 + $0xf8] sm:$0xff] }
 0x267   :  { %v536_v32 = vmul.f32 1.442695, %v533_v31 }
 0x269   :  { %1370 = vpow2.f32 %v536_v32 }
 0x272   :  { %v1369_v37 = vpop.eup %1368 }
 0x273   :  { %1278 = vmatprep.mubr.msk.f32.mxu0 %vm525_vm1, %v1369_v37 }
 0x276   :  { %v1371_v40 = vpop.eup %1370 }
 0x277   :  { %1279 = vmatmul.mubr.msk.f32.vlgmr.msra.gmra.mxu0 %vm525_vm1, %v1371_v40 }
 0x278   :  { %1282 = vmatpush3.msra.mxu0 %v415_v25 }
 0x279   :  { %1283 = vmatprep.subr.mxu0 %v414_v38 }
 0x27a   :  { %1284 = vmatpush3.msra.mxu0 %v414_v38 }
 0x27b   :  { %1285 = vmatprep.subr.mxu0 %v413_v21 }
 0x27c   :  { %1286 = vmatpush3.msra.mxu0 %v413_v21 }
 0x27d   :  { %1287 = vmatprep.subr.mxu0 %v412_v41 }
 0x27e   :  { %1288 = vmatpush3.msra.mxu0 %v412_v41 }
 0x27f   :  { %1289 = vmatprep.subr.mxu0 %v411_v43 }
 0x280   :  { %1290 = vmatpush3.msra.mxu0 %v411_v43 }
 0x281   :  { %1291 = vmatprep.subr.mxu0 %v410_v44 }
 0x282   :  { %1292 = vmatpush3.msra.mxu0 %v410_v44 }
 0x283   :  { %1293 = vmatprep.subr.mxu0 %v409_v24 }
 0x284   :  { %1294 = vmatpush3.msra.mxu0 %v409_v24  ;;  %v68_v24 = vld [vmem:[#allocation2 + $0x138] sm:$0xff] }
 0x285   :  { %1295 = vmatprep.subr.mxu0 %v408_v46  ;;  %1346 = vmatprep.subr.mxu1 %v68_v24 }
 0x286   :  { %1296 = vmatpush3.msra.mxu0 %v408_v46  ;;  %v67_v46 = vld [vmem:[#allocation2 + $0x130] sm:$0xff] }
 0x287   :  { %1311 = vmatprep.subr.mxu0 %v60_v60 }
 0x337   :  { %v1280_v36 = vpop.f32.mrf.mxu0 }
 0x338   :  { %1372 = vrcp.f32 %v1280_v36  ;;  %v64_v36 = vld [vmem:[#allocation2 + $0x118] sm:$0xff] }
 0x339   :  { %v610_v39 = vpop.f32.mrf.mxu0 }
 0x33a   :  { %1374 = vrcp.f32 %v610_v39  ;;  %v63_v39 = vld [vmem:[#allocation2 + $0x110] sm:$0xff] }
 0x345   :  { %v1373_v42 = vpop.eup %1372 }
 0x346   :  { %v622_v45 = vmul.f32 %v1373_v42, %v1371_v40  ;;  %v62_v42 = vld [vmem:[#allocation2 + $0x108] sm:$0xff] }
 0x347   :  { %v1375_v47 = vpop.eup %1374 }
 0x348   :  { %v620_v48 = vmul.f32 %v1375_v47, %v1369_v37  ;;  %v1091_v37 = vld [vmem:[#allocation2 + $0x1c5] ss:$0 sm:$0xff] }
 0x349   :  { %v61_v47 = vld [vmem:[#allocation2 + $0x100] sm:$0xff] }
 0x34a   :  { %1297 = vmatprep.mubr.msk.f32.mxu0 %vm525_vm1, %v620_v48  ;;  %v1092_v48 = vld [vmem:[#allocation2 + $0x1c6] ss:$0 sm:$0xff] }
 0x34b   :  { %1298 = vmatmul.mubr.msk.f32.vlgmr.msra.gmra.mxu0 %vm525_vm1, %v622_v45 }
 0x34c   :  { %1312 = vmatpush3.msra.mxu0 %v60_v60 }
 0x34d   :  { %1313 = vmatprep.subr.mxu0 %v59_v61 }
 0x34e   :  { %1314 = vmatpush3.msra.mxu0 %v59_v61 }
 0x34f   :  { %1315 = vmatprep.subr.mxu0 %v58_v9 }
 0x350   :  { %1316 = vmatpush3.msra.mxu0 %v58_v9 }
 0x351   :  { %1317 = vmatprep.subr.mxu0 %v57_v10 }
 0x352   :  { %1318 = vmatpush3.msra.mxu0 %v57_v10 }
 0x353   :  { %1319 = vmatprep.subr.mxu0 %v56_v11 }
 0x354   :  { %1320 = vmatpush3.msra.mxu0 %v56_v11 }
 0x355   :  { %1321 = vmatprep.subr.mxu0 %v55_v12 }
 0x356   :  { %1322 = vmatpush3.msra.mxu0 %v55_v12 }
 0x357   :  { %1323 = vmatprep.subr.mxu0 %v54_v13 }
 0x358   :  { %1324 = vmatpush3.msra.mxu0 %v54_v13 }
 0x359   :  { %1325 = vmatprep.subr.mxu0 %v53_v14 }
 0x35a   :  { %1326 = vmatpush3.msra.mxu0 %v53_v14 }
 0x35b   :  { %1327 = vmatprep.subr.mxu0 %v52_v15 }
 0x35c   :  { %1328 = vmatpush3.msra.mxu0 %v52_v15 }
 0x35d   :  { %1329 = vmatprep.subr.mxu0 %v51_v16 }
 0x35e   :  { %1330 = vmatpush3.msra.mxu0 %v51_v16 }
 0x35f   :  { %1331 = vmatprep.subr.mxu0 %v50_v17 }
 0x360   :  { %1332 = vmatpush3.msra.mxu0 %v50_v17 }
 0x361   :  { %1333 = vmatprep.subr.mxu0 %v49_v18 }
 0x362   :  { %1334 = vmatpush3.msra.mxu0 %v49_v18 }
 0x363   :  { %1335 = vmatprep.subr.mxu0 %v48_v19 }
 0x364   :  { %1336 = vmatpush3.msra.mxu0 %v48_v19 }
 0x365   :  { %1337 = vmatprep.subr.mxu0 %v47_v20 }
 0x366   :  { %1338 = vmatpush3.msra.mxu0 %v47_v20 }
 0x367   :  { %1339 = vmatprep.subr.mxu0 %v46_v22 }
 0x368   :  { %1340 = vmatpush3.msra.mxu0 %v46_v22 }
 0x369   :  { %1341 = vmatprep.subr.mxu0 %v45_v23 }
 0x36a   :  { %1342 = vmatpush3.msra.mxu0 %v45_v23 }
 0x40b   :  { %v1299_v51 = vpop.f32.mrf.mxu0 }
 0x40d   :  { %v695_v52 = vpop.f32.mrf.mxu0 }
 0x40e   :  { %1308 = vmatprep.mubr.msk.f32.mxu1 %vm100_vm0, %v695_v52 }
 0x40f   :  { %1309 = vmatmul.mubr.msk.f32.vlgmr.msra.gmra.mxu1 %vm100_vm0, %v1299_v51 }
 0x410   :  { %1347 = vmatpush3.msra.mxu1 %v68_v24 }
 0x411   :  { %1348 = vmatprep.subr.mxu1 %v67_v46 }
 0x412   :  { %1349 = vmatpush3.msra.mxu1 %v67_v46 }
 0x413   :  { %1350 = vmatprep.subr.mxu1 %v66_v30 }
 0x414   :  { %1351 = vmatpush3.msra.mxu1 %v66_v30 }
 0x415   :  { %1352 = vmatprep.subr.mxu1 %v65_v33 }
 0x416   :  { %1353 = vmatpush3.msra.mxu1 %v65_v33 }
 0x417   :  { %1354 = vmatprep.subr.mxu1 %v64_v36 }
 0x418   :  { %1355 = vmatpush3.msra.mxu1 %v64_v36 }
 0x419   :  { %1356 = vmatprep.subr.mxu1 %v63_v39 }
 0x41a   :  { %1357 = vmatpush3.msra.mxu1 %v63_v39 }
 0x41b   :  { %1358 = vmatprep.subr.mxu1 %v62_v42 }
 0x41c   :  { %1359 = vmatpush3.msra.mxu1 %v62_v42 }
 0x41d   :  { %1360 = vmatprep.subr.mxu1 %v61_v47 }
 0x41e   :  { %1361 = vmatpush3.msra.mxu1 %v61_v47 }
 0x4cf   :  { %v1310_v53 = vpop.f32.mrf.mxu1 }
 0x4d0   :  { %v786_v57 = vadd.f32 %v1310_v53, %v1086_v54 }
 0x4d1   :  { %v780_v55 = vpop.f32.mrf.mxu1 }
 0x4d2   :  { %v781_v56 = vadd.f32 %v1086_v54, %v780_v55  ;;  %v790_v59 = vadd.f32 %v786_v57, %v1443_v5 }
 0x4d4   :  { %v789_v58 = vadd.f32 %v781_v56, %v1434_v2 }
 0x4d6   :  { %791 = vadd.xlane.f32.xlu1 %v789_v58 }
 0x4da   :  { %793 = vadd.xlane.f32.xlu1 %v790_v59 }
 0x55f   :  { %v792_v62 = vpop.xlane.xlu1 %791 }
 0x560   :  { %v795_v63 = vmul.f32 0.03125, %v792_v62  ;;  %v1093_v62 = vld [vmem:[#allocation2 + $0x1c7] ss:$0 sm:$0xff] }
 0x562   :  { %v797_v1 = vsub.f32 %v789_v58, %v795_v63 }
 0x563   :  { %v794_v3 = vpop.xlane.xlu1 %793 }
 0x564   :  { %v796_v4 = vmul.f32 0.03125, %v794_v3  ;;  %v803_v6 = vmul.f32 %v1543_v0, %v797_v1 }
 0x566   :  { %v798_v2 = vsub.f32 %v790_v59, %v796_v4  ;;  %v805_v7 = vmul.f32 %v803_v6, %v803_v6 }
 0x568   :  { %807 = vadd.xlane.f32.xlu0 %v805_v7  ;;  %v804_v5 = vmul.f32 %v1543_v0, %v798_v2 }
 0x56a   :  { %v806_v8 = vmul.f32 %v804_v5, %v804_v5 }
 0x56c   :  { %809 = vadd.xlane.f32.xlu1 %v806_v8 }
 0x5f1   :  { %v808_v25 = vpop.xlane.xlu0 %807 }
 0x5f2   :  { %v811_v26 = vmul.f32 0.03125, %v808_v25  ;;  %v1096_v25 = vld [vmem:[#allocation2 + $0x1c8] ss:$0 sm:$0xff] }
 0x5f4   :  { %v813_v27 = vadd.f32 1e-12, %v811_v26 }
 0x5f5   :  { %v810_v28 = vpop.xlane.xlu1 %809 }
 0x5f6   :  { %1376 = vrsqrt.f32 %v813_v27  ;;  %v812_v29 = vmul.f32 0.03125, %v810_v28  ;;  %v1097_v28 = vld [vmem:[#allocation2 + $0x1c9] ss:$0 sm:$0xff] }
 0x5f8   :  { %v814_v31 = vadd.f32 1e-12, %v812_v29 }
 0x5fa   :  { %1378 = vrsqrt.f32 %v814_v31 }
 0x603   :  { %v1377_v32 = vpop.eup %1376 }
 0x604   :  { %v817_v35 = vmul.f32 %v1377_v32, %v803_v6 }
 0x606   :  { %v823_v38 = vmul.f32 %v1090_v34, %v817_v35 }
 0x607   :  { %v1379_v40 = vpop.eup %1378 }
 0x608   :  { %v818_v21 = vmul.f32 %v1379_v40, %v804_v5  ;;  %v829_v41 = vadd.f32 %v1091_v37, %v823_v38 }
 0x60a   :  { %v824_v43 = vmul.f32 %v1090_v34, %v818_v21  ;;  %1343 = vmatprep.mubr.f32.mxu0 %v829_v41 }
 0x60c   :  { %v830_v44 = vadd.f32 %v1091_v37, %v824_v43 }
 0x60e   :  { %1344 = vmatmul.mubr.f32.vlgmr.msra.gmra.mxu0 %v830_v44 }
 0x6ce   :  { %v1345_v45 = vpop.f32.mrf.mxu0 }
 0x6cf   :  { %v907_v49 = vadd.f32 %v1345_v45, %v1092_v48 }
 0x6d0   :  { %v901_v50 = vpop.f32.mrf.mxu0 }
 0x6d1   :  { %v914_v51 = vmul.f32 0.70710677, %v907_v49  ;;  %v902_v52 = vadd.f32 %v1092_v48, %v901_v50  ;;  %v911_v59 = vmul.f32 0.5, %v907_v49 }
 0x6d3   :  { %1380 = verf.f32 %v914_v51  ;;  %v913_v53 = vmul.f32 0.70710677, %v902_v52  ;;  %v910_v57 = vmul.f32 0.5, %v902_v52 }
 0x6d5   :  { %1382 = verf.f32 %v913_v53 }
 0x6e0   :  { %v1381_v54 = vpop.eup %1380 }
 0x6e1   :  { %v918_v56 = vadd.f32 1.0, %v1381_v54 }
 0x6e2   :  { %v1383_v55 = vpop.eup %1382 }
 0x6e3   :  { %v917_v58 = vadd.f32 1.0, %v1383_v55  ;;  %v920_v61 = vmul.f32 %v918_v56, %v911_v59 }
 0x6e5   :  { %v919_v60 = vmul.f32 %v917_v58, %v910_v57 }
 0x6e7   :  { %1362 = vmatprep.mubr.msk.f32.mxu1 %vm525_vm1, %v919_v60 }
 0x6e8   :  { %1363 = vmatmul.mubr.msk.f32.vlgmr.msra.gmra.mxu1 %vm525_vm1, %v920_v61 }
 0x7a8   :  { %v1364_v63 = vpop.f32.mrf.mxu1 }
 0x7a9   :  { %v1003_v1 = vadd.f32 %v1364_v63, %v1093_v62 }
 0x7aa   :  { %v997_v3 = vpop.f32.mrf.mxu1 }
 0x7ab   :  { %v998_v4 = vadd.f32 %v1093_v62, %v997_v3  ;;  %v1007_v6 = vadd.f32 %v1003_v1, %v830_v44 }
 0x7ad   :  { %1010 = vadd.xlane.f32.xlu1 %v1007_v6  ;;  %v1006_v2 = vadd.f32 %v998_v4, %v829_v41 }
 0x7af   :  { %1008 = vadd.xlane.f32.xlu0 %v1006_v2 }
 0x836   :  { %v1011_v7 = vpop.xlane.xlu1 %1010 }
 0x837   :  { %v1013_v5 = vmul.f32 0.03125, %v1011_v7 }
 0x838   :  { %v1009_v8 = vpop.xlane.xlu0 %1008 }
 0x839   :  { %v1015_v9 = vsub.f32 %v1007_v6, %v1013_v5  ;;  %v1012_v10 = vmul.f32 0.03125, %v1009_v8 }
 0x83b   :  { %v1014_v11 = vsub.f32 %v1006_v2, %v1012_v10  ;;  %v1017_v12 = vmul.f32 %v1543_v0, %v1015_v9 }
 0x83d   :  { %v1019_v13 = vmul.f32 %v1017_v12, %v1017_v12  ;;  %v1016_v14 = vmul.f32 %v1543_v0, %v1014_v11 }
 0x83f   :  { %1022 = vadd.xlane.f32.xlu1 %v1019_v13  ;;  %v1018_v15 = vmul.f32 %v1016_v14, %v1016_v14 }
 0x841   :  { %1020 = vadd.xlane.f32.xlu0 %v1018_v15 }
 0x8c8   :  { %v1023_v16 = vpop.xlane.xlu1 %1022 }
 0x8c9   :  { %v1025_v17 = vmul.f32 0.03125, %v1023_v16 }
 0x8ca   :  { %v1021_v18 = vpop.xlane.xlu0 %1020 }
 0x8cb   :  { %v1027_v19 = vadd.f32 1e-12, %v1025_v17  ;;  %v1024_v20 = vmul.f32 0.03125, %v1021_v18 }
 0x8cd   :  { %1384 = vrsqrt.f32 %v1027_v19  ;;  %v1026_v22 = vadd.f32 1e-12, %v1024_v20 }
 0x8cf   :  { %1386 = vrsqrt.f32 %v1026_v22 }
 0x8da   :  { %v1385_v23 = vpop.eup %1384 }
 0x8db   :  { %v1031_v26 = vmul.f32 %v1385_v23, %v1017_v12 }
 0x8dc   :  { %v1387_v27 = vpop.eup %1386 }
 0x8dd   :  { %v1037_v29 = vmul.f32 %v1096_v25, %v1031_v26  ;;  %v1030_v31 = vmul.f32 %v1387_v27, %v1016_v14 }
 0x8df   :  { %v1043_v32 = vadd.f32 %v1097_v28, %v1037_v29  ;;  %v1036_v0 = vmul.f32 %v1096_v25, %v1030_v31 }
 0x8e1   :  { %1045 = vst [vmem:[%s1559_s2 + $0x8] sm:$0xff] %v1043_v32  ;;  %v1042_v34 = vadd.f32 %v1097_v28, %v1036_v0 }
 0x8e3   :  { %1044 = vst [vmem:[%s1559_s2] sm:$0xff] %v1042_v34 }
 0x8e4   :  { %1050 = vsyncpa [#allocation3], 1 }

</bundles_post_ra>
